<compile_context>
chip_gen: v7x
topology: tpu7x:2x2x1
jax: 0.10.0
libtpu: 0.0.40
codegen_flags: <defaults>
</compile_context>

<pallas_src>
import jax
import jax.numpy as jnp
from jax.experimental import pallas as pl
from jax.experimental.pallas import tpu as pltpu

B, C, H, W = 2, 4, 16, 16
D = C * H * W                 # 1024 flattened features (lane-dense, 8*128)
NUM_CLASSES = 10

B_PAD = 8                     # sublane multiple: full f32 vreg occupancy
N_PAD = 128                   # lane-dense output width (unmasked stores)

# Single diffusion step constants: alpha_bar at the purification timestep t*.
_ALPHA_BAR = 0.9
_SQRT_AB = float(_ALPHA_BAR ** 0.5)
_SQRT_1MAB = float((1.0 - _ALPHA_BAR) ** 0.5)
# Folded forward-diffusion affine:  sqrt(ab)*((x-0.5)*2) = (2*sqrt(ab))*x - sqrt(ab)
_X_SCALE = 2.0 * _SQRT_AB
_X_SHIFT = _SQRT_AB


def sde_adv_kernel(x_ref, eps_ref, w_ref, b_ref, o_ref):
    """Fused: rescale -> diffuse -> denoise -> clamp -> fully-folded linear head."""
    x = x_ref[...]                                   # (B_PAD, D), values in [0, 1]
    eps = eps_ref[...]                               # (B_PAD, D) gaussian noise

    # Forward diffusion to t* with the [0,1]->[-1,1] rescale folded in.
    x_t = _X_SCALE * x - _X_SHIFT + _SQRT_1MAB * eps

    # TODO(synk): the real runner wraps a pretrained score-model U-Net; this
    # tanh surrogate keeps the SDE arithmetic real but is not a checkpoint.
    eps_pred = jnp.tanh(x_t)                         # EUP transcendental (free slot)

    # Purified image, clamp expressed in the *unscaled* domain:
    #   x_re = clip((x_t - s*eps_pred)/sqrt_ab, -1, 1)
    #        = (1/sqrt_ab) * clip(x_t - s*eps_pred, -sqrt_ab, sqrt_ab)
    # The (1/sqrt_ab) factor and classifier's (x_re+1)*0.5 affine are folded
    # into w_ref / b_ref at init, so the matmul consumes y directly.
    y = jnp.clip(x_t - _SQRT_1MAB * eps_pred, -_SQRT_AB, _SQRT_AB)

    logits = jnp.dot(y, w_ref[...], preferred_element_type=jnp.float32)
    o_ref[...] = logits + b_ref[...]                 # (B_PAD, N_PAD)


@jax.jit
def sde_adv_forward(x_nchw, eps_nchw, w_pad, b_pad):
    """Jitted wrapper: pad to TPU-friendly shapes, run the fused kernel, slice."""
    x_flat = x_nchw.reshape(B, D).astype(jnp.float32)
    eps_flat = eps_nchw.reshape(B, D).astype(jnp.float32)
    x_p = jnp.zeros((B_PAD, D), jnp.float32).at[:B].set(x_flat)
    eps_p = jnp.zeros((B_PAD, D), jnp.float32).at[:B].set(eps_flat)

    vmem = lambda: pl.BlockSpec(memory_space=pltpu.MemorySpace.VMEM)
    out = pl.pallas_call(
        sde_adv_kernel,
        out_shape=jax.ShapeDtypeStruct((B_PAD, N_PAD), jnp.float32),
        # No grid: single invocation, whole arrays resident in VMEM (~72 KB),
        # avoids 1-step pipeline prologue/epilogue and double-buffering.
        in_specs=[vmem(), vmem(), vmem(), vmem()],
        out_specs=vmem(),
    )(x_p, eps_p, w_pad, b_pad)
    # NOTE(v7x): if B is scaled up for real eval batches, add a leading
    # "parallel" grid axis over batch tiles so both TensorCores are used.
    return out[:B, :NUM_CLASSES]


class SDEAdvModel:
    """Thin stateful wrapper mirroring the PyTorch module's counter buffer."""

    def __init__(self, w, b):
        w = jnp.asarray(w, jnp.float32)              # (D, NUM_CLASSES)
        b = jnp.asarray(b, jnp.float32)              # (NUM_CLASSES,)
        # Fold both the purification rescale (1/sqrt_ab) and the classifier's
        # (x_re + 1) * 0.5 input affine into the params:
        #   ((c*y + 1) * 0.5) @ W + b = y @ (0.5*c*W) + (b + 0.5*sum(W, axis=0))
        w_fold = (0.5 / _SQRT_AB) * w
        b_fold = b + 0.5 * jnp.sum(w, axis=0)
        # Pad to lane-dense class width once, at init (not per call).
        self.w_pad = jnp.zeros((D, N_PAD), jnp.float32).at[:, :NUM_CLASSES].set(w_fold)
        self.b_pad = jnp.zeros((1, N_PAD), jnp.float32).at[:, :NUM_CLASSES].set(b_fold)
        self.counter = 0          # register_buffer('counter', zeros(1))
        self.tag = None

    def reset_counter(self):
        self.counter = 0

    def set_tag(self, tag=None):
        self.tag = tag

    def __call__(self, x_nchw, eps_nchw):
        out = sde_adv_forward(x_nchw, eps_nchw, self.w_pad, self.b_pad)
        self.counter += 1         # self.counter += 1 in the module
        return out


def _reference(x_nchw, eps_nchw, w, b):
    """Pure-JAX reference of the (unfolded) forward pass, for a sanity check."""
    x2 = (x_nchw.reshape(B, D) - 0.5) * 2.0
    x_t = _SQRT_AB * x2 + _SQRT_1MAB * eps_nchw.reshape(B, D)
    eps_pred = jnp.tanh(x_t)
    x_re = jnp.clip((x_t - _SQRT_1MAB * eps_pred) / _SQRT_AB, -1.0, 1.0)
    feat = (x_re + 1.0) * 0.5
    return feat @ w + b


if __name__ == "__main__":
    key = jax.random.PRNGKey(0)
    kx, keps, kw = jax.random.split(key, 3)

    # Deterministic inputs / parameters (synthetic, not a checkpoint load).
    x = jax.random.uniform(kx, (B, C, H, W), dtype=jnp.float32)        # NCHW in [0,1]
    eps = jax.random.normal(keps, (B, C, H, W), dtype=jnp.float32)     # diffusion noise
    w_cls = 0.02 * jax.random.normal(kw, (D, NUM_CLASSES), dtype=jnp.float32)
    b_cls = jnp.zeros((NUM_CLASSES,), dtype=jnp.float32)

    model = SDEAdvModel(w_cls, b_cls)
    logits = model(x, eps)
    jax.block_until_ready(logits)

    assert logits.shape == (B, NUM_CLASSES)
    assert logits.dtype == jnp.float32

    ref = _reference(x, eps, w_cls, b_cls)
    assert jnp.allclose(logits, ref, rtol=1e-4, atol=1e-4), "mismatch vs reference"

    print("KERNEL_OK")
</pallas_src>

<mosaic_0001>
module attributes {stable_mosaic.version = 11 : i64} {
  func.func @sde_adv_kernel(%arg0: memref<8x1024xf32, #tpu.memory_space<vmem>>, %arg1: memref<8x1024xf32, #tpu.memory_space<vmem>>, %arg2: memref<1024x128xf32, #tpu.memory_space<vmem>>, %arg3: memref<1x128xf32, #tpu.memory_space<vmem>>, %arg4: memref<8x128xf32, #tpu.memory_space<vmem>>) attributes {dimension_semantics = [], scalar_prefetch = 0 : i64, scratch_operands = 0 : i64, tpu.core_type = #tpu.core_type<tc>} {
    %c0 = arith.constant 0 : index
    %c0_0 = arith.constant 0 : index
    %0 = vector.load %arg0[%c0, %c0_0] : memref<8x1024xf32, #tpu.memory_space<vmem>>, vector<8x1024xf32>
    %c0_1 = arith.constant 0 : index
    %c0_2 = arith.constant 0 : index
    %1 = vector.load %arg1[%c0_1, %c0_2] : memref<8x1024xf32, #tpu.memory_space<vmem>>, vector<8x1024xf32>
    %cst = arith.constant 1.89736664 : f32
    %2 = vector.broadcast %cst : f32 to vector<8x1024xf32>
    %3 = arith.mulf %2, %0 : vector<8x1024xf32>
    %cst_3 = arith.constant 0.948683321 : f32
    %4 = vector.broadcast %cst_3 : f32 to vector<8x1024xf32>
    %5 = arith.subf %3, %4 : vector<8x1024xf32>
    %cst_4 = arith.constant 0.316227764 : f32
    %6 = vector.broadcast %cst_4 : f32 to vector<8x1024xf32>
    %7 = arith.mulf %6, %1 : vector<8x1024xf32>
    %8 = arith.addf %5, %7 : vector<8x1024xf32>
    %9 = math.tanh %8 : vector<8x1024xf32>
    %cst_5 = arith.constant 0.316227764 : f32
    %10 = vector.broadcast %cst_5 : f32 to vector<8x1024xf32>
    %11 = arith.mulf %10, %9 : vector<8x1024xf32>
    %12 = arith.subf %8, %11 : vector<8x1024xf32>
    %cst_6 = arith.constant -0.948683321 : f32
    %cst_7 = arith.constant 0.948683321 : f32
    %13 = vector.broadcast %cst_6 : f32 to vector<8x1024xf32>
    %14 = arith.maximumf %13, %12 : vector<8x1024xf32>
    %15 = vector.broadcast %cst_7 : f32 to vector<8x1024xf32>
    %16 = arith.minimumf %15, %14 : vector<8x1024xf32>
    %c0_8 = arith.constant 0 : index
    %c0_9 = arith.constant 0 : index
    %17 = vector.load %arg2[%c0_8, %c0_9] : memref<1024x128xf32, #tpu.memory_space<vmem>>, vector<1024x128xf32>
    %cst_10 = arith.constant dense<0.000000e+00> : vector<8x128xf32>
    %18 = tpu.matmul %16, %17, %cst_10 {dimension_numbers = #tpu.dot_dimension_numbers<[1], [0], [0], [1], [0, 0, 1, 1], [], []>} : vector<8x1024xf32>, vector<1024x128xf32>, vector<8x128xf32> -> vector<8x128xf32>
    %c0_11 = arith.constant 0 : index
    %c0_12 = arith.constant 0 : index
    %19 = vector.load %arg3[%c0_11, %c0_12] : memref<1x128xf32, #tpu.memory_space<vmem>>, vector<1x128xf32>
    %20 = vector.broadcast %19 : vector<1x128xf32> to vector<8x128xf32>
    %21 = arith.addf %18, %20 : vector<8x128xf32>
    %c0_13 = arith.constant 0 : index
    %c0_14 = arith.constant 0 : index
    %22 = vector.load %arg4[%c0_13, %c0_14] : memref<8x128xf32, #tpu.memory_space<vmem>>, vector<8x128xf32>
    tpu.vector_store %arg4[%c0_13, %c0_14], %21 {strides = array<i32>} : memref<8x128xf32, #tpu.memory_space<vmem>>, vector<8x128xf32>,
    return
  }
}

</mosaic_0001>

<bundles_post_ra>
// kernel: sde_adv_forward.1
= control target key start
LH: loop header
LB: loop body
LE: loop exit
PB: predicated region body
PF: predicated region fallthrough
CT: control target
= control target key end

     0   :  { %9 = vsyncpa [#allocation3], 0  ;;  %s868_s15 = smov [#allocation2]   ;;  %s978_s0 = inlined_call_operand.vmem [shape: f32[8,1024], index: 0, kind: input, shape index: {}]   ;;  %s979_s1 = inlined_call_operand.vmem [shape: f32[8,1024], index: 1, kind: input, shape index: {}]   ;;  %s980_s2 = inlined_call_operand.hbm [shape: f32[1024,128], index: 2, kind: input, shape index: {}]   ;;  %s981_s3 = inlined_call_operand.vmem [shape: f32[1,128], index: 3, kind: input, shape index: {}]   ;;  %s982_s4 = inlined_call_operand.vmem [shape: f32[8,128], index: 4, kind: output, shape index: {}]  }
   0x1   :  { %s19_s16 = sshll.u32 %s868_s15, 4  ;;  %s844_s19 = scalar_lea.hbm %s980_s2, 16384  ;;  %s20_s16 = int_to_ptr.vmem [resolvable:$true] %s19_s16 }
   0x2   :  { %p845_p0 = scmp.ne.s32.totalorder %s980_s2, %s844_s19  ;;  %p848_p1 = scmp.lt.u32.totalorder %s844_s19, %s980_s2 }
   0x4   :  { %p850_p2 = pnand %p848_p1, %p845_p0 }
   0x6   :  { %853 = shalt.err (!%p850_p2)
}
   0x7   :  { %s854_s24 = scalar_lea.vmem %s20_s16, 16384  ;;  %p859_p4 = scmp.lt.s32.totalorder %s20_s16, %s20_s16 }
   0x8   :  { %p855_p3 = scmp.ne.s32.totalorder %s20_s16, %s854_s24  ;;  %p860_p5 = scmp.lt.s32.totalorder %s854_s24, %s854_s24 }
   0xa   :  { %p861_p6 = por %p860_p5, %p859_p4 }
   0xc   :  { %p862_p7 = pnand %p861_p6, %p855_p3 }
   0xe   :  { %865 = shalt.err (!%p862_p7)
}
   0xf   :  { %s869_s25 = smov 128   ;;  %s870_s26 = smov 8  }
  0x10   :  { %25 = dma.hbm_to_vmem [thread:$0]  %s980_s2, 16384, %s20_s16, [#allocation3], %s869_s25, %s869_s25, %s870_s26  }
  0x11   :  { %866 = dma.done.wait [#allocation3], 16384  }
  0x12   :  { %867 = vsyncadd [#allocation3], 4294950912  ;;  %v135_v0 = vld [vmem:[#allocation2 + $0x80] sm:$0xff]  ;;  %v136_v1 = vld [vmem:[#allocation2 + $0x88] sm:$0xff] }
  0x13   :  { %v119_v2 = vld [vmem:[#allocation2] sm:$0xff]  ;;  %v697_v3 = vpack.c.bf16 %v136_v1, %v135_v0  ;;  %v120_v4 = vld [vmem:[#allocation2 + $0x8] sm:$0xff]  ;;  %v137_v11 = vld [vmem:[#allocation2 + $0x90] sm:$0xff] }
  0x14   :  { %v167_v5 = vld [vmem:[#allocation2 + $0x180] sm:$0xff]  ;;  %v168_v6 = vld [vmem:[#allocation2 + $0x188] sm:$0xff]  ;;  %v699_v7 = vpack.c.bf16 %v120_v4, %v119_v2  ;;  %v138_v13 = vld [vmem:[#allocation2 + $0x98] sm:$0xff] }
  0x15   :  { %v729_v8 = vpack.c.bf16 %v168_v6, %v167_v5  ;;  %v151_v9 = vld [vmem:[#allocation2 + $0x100] sm:$0xff]  ;;  %v152_v10 = vld [vmem:[#allocation2 + $0x108] sm:$0xff]  ;;  %698 = vmatprep.subr.bf16.mxu0 %v697_v3  ;;  %v121_v14 = vld [vmem:[#allocation2 + $0x10] sm:$0xff]  ;;  %v701_v16 = vpack.c.bf16 %v138_v13, %v137_v11 }
  0x16   :  { %v731_v12 = vpack.c.bf16 %v152_v10, %v151_v9  ;;  %v122_v15 = vld [vmem:[#allocation2 + $0x18] sm:$0xff]  ;;  %700 = vmatpush3.bf16.msra.mxu0 %v699_v7  ;;  %v169_v18 = vld [vmem:[#allocation2 + $0x190] sm:$0xff]  ;;  %v139_v23 = vld [vmem:[#allocation2 + $0xa0] sm:$0xff] }
  0x17   :  { %730 = vmatprep.subr.bf16.mxu1 %v729_v8  ;;  %v703_v17 = vpack.c.bf16 %v122_v15, %v121_v14  ;;  %v170_v19 = vld [vmem:[#allocation2 + $0x198] sm:$0xff]  ;;  %v153_v20 = vld [vmem:[#allocation2 + $0x110] sm:$0xff]  ;;  %v140_v24 = vld [vmem:[#allocation2 + $0xa8] sm:$0xff]  ;;  %702 = vmatprep.subr.bf16.mxu0 %v701_v16 }
  0x18   :  { %732 = vmatpush3.bf16.msra.mxu1 %v731_v12  ;;  %v733_v21 = vpack.c.bf16 %v170_v19, %v169_v18  ;;  %v154_v22 = vld [vmem:[#allocation2 + $0x118] sm:$0xff]  ;;  %v705_v26 = vpack.c.bf16 %v140_v24, %v139_v23  ;;  %v123_v27 = vld [vmem:[#allocation2 + $0x20] sm:$0xff]  ;;  %v124_v28 = vld [vmem:[#allocation2 + $0x28] sm:$0xff] }
  0x19   :  { %v735_v25 = vpack.c.bf16 %v154_v22, %v153_v20  ;;  %v171_v29 = vld [vmem:[#allocation2 + $0x1a0] sm:$0xff]  ;;  %v172_v30 = vld [vmem:[#allocation2 + $0x1a8] sm:$0xff]  ;;  %v707_v33 = vpack.c.bf16 %v124_v28, %v123_v27  ;;  %v141_v35 = vld [vmem:[#allocation2 + $0xb0] sm:$0xff] }
  0x1a   :  { %734 = vmatprep.subr.bf16.mxu1 %v733_v21  ;;  %v155_v31 = vld [vmem:[#allocation2 + $0x120] sm:$0xff]  ;;  %v156_v32 = vld [vmem:[#allocation2 + $0x128] sm:$0xff]  ;;  %704 = vmatpush3.bf16.msra.mxu0 %v703_v17  ;;  %v737_v34 = vpack.c.bf16 %v172_v30, %v171_v29  ;;  %v142_v36 = vld [vmem:[#allocation2 + $0xb8] sm:$0xff] }
  0x1b   :  { %v125_v37 = vld [vmem:[#allocation2 + $0x30] sm:$0xff]  ;;  %706 = vmatprep.subr.bf16.mxu0 %v705_v26  ;;  %v739_v38 = vpack.c.bf16 %v156_v32, %v155_v31  ;;  %v709_v39 = vpack.c.bf16 %v142_v36, %v141_v35  ;;  %v126_v40 = vld [vmem:[#allocation2 + $0x38] sm:$0xff]  ;;  %v143_v46 = vld [vmem:[#allocation2 + $0xc0] sm:$0xff] }
  0x1c   :  { %736 = vmatpush3.bf16.msra.mxu1 %v735_v25  ;;  %v173_v41 = vld [vmem:[#allocation2 + $0x1b0] sm:$0xff]  ;;  %v174_v42 = vld [vmem:[#allocation2 + $0x1b8] sm:$0xff]  ;;  %v144_v47 = vld [vmem:[#allocation2 + $0xc8] sm:$0xff]  ;;  %v711_v48 = vpack.c.bf16 %v126_v40, %v125_v37 }
  0x1d   :  { %738 = vmatprep.subr.bf16.mxu1 %v737_v34  ;;  %v741_v43 = vpack.c.bf16 %v174_v42, %v173_v41  ;;  %v157_v44 = vld [vmem:[#allocation2 + $0x130] sm:$0xff]  ;;  %v158_v45 = vld [vmem:[#allocation2 + $0x138] sm:$0xff]  ;;  %v175_v49 = vld [vmem:[#allocation2 + $0x1c0] sm:$0xff]  ;;  %v713_v52 = vpack.c.bf16 %v144_v47, %v143_v46 }
  0x1e   :  { %708 = vmatpush3.bf16.msra.mxu0 %v707_v33  ;;  %v176_v50 = vld [vmem:[#allocation2 + $0x1c8] sm:$0xff]  ;;  %v743_v51 = vpack.c.bf16 %v158_v45, %v157_v44  ;;  %v127_v53 = vld [vmem:[#allocation2 + $0x40] sm:$0xff]  ;;  %v145_v58 = vld [vmem:[#allocation2 + $0xd0] sm:$0xff] }
  0x1f   :  { %710 = vmatprep.subr.bf16.mxu0 %v709_v39  ;;  %v128_v54 = vld [vmem:[#allocation2 + $0x48] sm:$0xff]  ;;  %v159_v55 = vld [vmem:[#allocation2 + $0x140] sm:$0xff]  ;;  %v745_v56 = vpack.c.bf16 %v176_v50, %v175_v49  ;;  %v146_v59 = vld [vmem:[#allocation2 + $0xd8] sm:$0xff] }
  0x20   :  { %740 = vmatpush3.bf16.msra.mxu1 %v739_v38  ;;  %v160_v57 = vld [vmem:[#allocation2 + $0x148] sm:$0xff]  ;;  %v177_v60 = vld [vmem:[#allocation2 + $0x1d0] sm:$0xff]  ;;  %v178_v61 = vld [vmem:[#allocation2 + $0x1d8] sm:$0xff]  ;;  %v715_v62 = vpack.c.bf16 %v128_v54, %v127_v53  ;;  %v717_v0 = vpack.c.bf16 %v146_v59, %v145_v58 }
  0x21   :  { %742 = vmatprep.subr.bf16.mxu1 %v741_v43  ;;  %v747_v63 = vpack.c.bf16 %v160_v57, %v159_v55  ;;  %v129_v1 = vld [vmem:[#allocation2 + $0x50] sm:$0xff]  ;;  %v130_v2 = vld [vmem:[#allocation2 + $0x58] sm:$0xff]  ;;  %v749_v4 = vpack.c.bf16 %v178_v61, %v177_v60  ;;  %v147_v6 = vld [vmem:[#allocation2 + $0xe0] sm:$0xff] }
  0x22   :  { %712 = vmatpush3.bf16.msra.mxu0 %v711_v48  ;;  %v161_v3 = vld [vmem:[#allocation2 + $0x150] sm:$0xff]  ;;  %v162_v5 = vld [vmem:[#allocation2 + $0x158] sm:$0xff]  ;;  %v148_v7 = vld [vmem:[#allocation2 + $0xe8] sm:$0xff]  ;;  %v719_v12 = vpack.c.bf16 %v130_v2, %v129_v1 }
  0x23   :  { %714 = vmatprep.subr.bf16.mxu0 %v713_v52  ;;  %v131_v8 = vld [vmem:[#allocation2 + $0x60] sm:$0xff]  ;;  %v132_v9 = vld [vmem:[#allocation2 + $0x68] sm:$0xff]  ;;  %v149_v15 = vld [vmem:[#allocation2 + $0xf0] sm:$0xff]  ;;  %v751_v16 = vpack.c.bf16 %v162_v5, %v161_v3  ;;  %v721_v17 = vpack.c.bf16 %v148_v7, %v147_v6 }
  0x24   :  { %744 = vmatpush3.bf16.msra.mxu1 %v743_v51  ;;  %v179_v10 = vld [vmem:[#allocation2 + $0x1e0] sm:$0xff]  ;;  %v180_v11 = vld [vmem:[#allocation2 + $0x1e8] sm:$0xff]  ;;  %v150_v18 = vld [vmem:[#allocation2 + $0xf8] sm:$0xff]  ;;  %v723_v32 = vpack.c.bf16 %v132_v9, %v131_v8 }
  0x25   :  { %746 = vmatprep.subr.bf16.mxu1 %v745_v56  ;;  %v163_v13 = vld [vmem:[#allocation2 + $0x160] sm:$0xff]  ;;  %v164_v14 = vld [vmem:[#allocation2 + $0x168] sm:$0xff]  ;;  %v753_v21 = vpack.c.bf16 %v180_v11, %v179_v10  ;;  %v133_v26 = vld [vmem:[#allocation2 + $0x70] sm:$0xff]  ;;  %v725_v39 = vpack.c.bf16 %v150_v18, %v149_v15 }
  0x26   :  { %716 = vmatpush3.bf16.msra.mxu0 %v715_v62  ;;  %v32_v19 = vld [vmem:[%s978_s0 + $0x8] sm:$0xff]  ;;  %v31_v24 = vld [vmem:[%s978_s0] sm:$0xff]  ;;  %v134_v27 = vld [vmem:[#allocation2 + $0x78] sm:$0xff]  ;;  %v755_v33 = vpack.c.bf16 %v164_v14, %v163_v13 }
  0x27   :  { %718 = vmatprep.subr.bf16.mxu0 %v717_v0  ;;  %v40_v20 = vld [vmem:[%s979_s1 + $0x8] sm:$0xff]  ;;  %v48_v22 = vmul.f32 1.8973666, %v32_v19  ;;  %v39_v25 = vld [vmem:[%s979_s1] sm:$0xff]  ;;  %v181_v28 = vld [vmem:[#allocation2 + $0x1f0] sm:$0xff]  ;;  %v727_v53 = vpack.c.bf16 %v134_v27, %v133_v26 }
  0x28   :  { %748 = vmatpush3.bf16.msra.mxu1 %v747_v63  ;;  %v64_v23 = vmul.f32 0.31622776, %v40_v20  ;;  %v182_v29 = vld [vmem:[#allocation2 + $0x1f8] sm:$0xff]  ;;  %v47_v30 = vmul.f32 1.8973666, %v31_v24  ;;  %v165_v34 = vld [vmem:[#allocation2 + $0x170] sm:$0xff] }
  0x29   :  { %750 = vmatprep.subr.bf16.mxu1 %v749_v4  ;;  %v63_v31 = vmul.f32 0.31622776, %v39_v25  ;;  %v166_v35 = vld [vmem:[#allocation2 + $0x178] sm:$0xff]  ;;  %v541_v36 = vadd.f32 -0.9486833, %v48_v22  ;;  %v757_v43 = vpack.c.bf16 %v182_v29, %v181_v28  ;;  %v199_v45 = vld [vmem:[#allocation2 + $0x280] sm:$0xff] }
  0x2a   :  { %720 = vmatpush3.bf16.msra.mxu0 %v719_v12  ;;  %v34_v37 = vld [vmem:[%s978_s0 + $0x18] sm:$0xff]  ;;  %v540_v40 = vadd.f32 -0.9486833, %v47_v30  ;;  %v200_v46 = vld [vmem:[#allocation2 + $0x288] sm:$0xff]  ;;  %v231_v47 = vld [vmem:[#allocation2 + $0x380] sm:$0xff]  ;;  %v759_v56 = vpack.c.bf16 %v166_v35, %v165_v34 }
  0x2b   :  { %v42_v38 = vld [vmem:[%s979_s1 + $0x18] sm:$0xff]  ;;  %722 = vmatprep.subr.bf16.mxu0 %v721_v17  ;;  %v50_v41 = vmul.f32 1.8973666, %v34_v37  ;;  %v72_v44 = vadd.f32 %v541_v36, %v64_v23  ;;  %v232_v50 = vld [vmem:[#allocation2 + $0x388] sm:$0xff]  ;;  %v33_v51 = vld [vmem:[%s978_s0 + $0x10] sm:$0xff]  ;;  %v761_v57 = vpack.c.bf16 %v200_v46, %v199_v45 }
  0x2c   :  { %752 = vmatpush3.bf16.msra.mxu1 %v751_v16  ;;  %v66_v42 = vmul.f32 0.31622776, %v42_v38  ;;  %v71_v48 = vadd.f32 %v540_v40, %v63_v31  ;;  %v41_v52 = vld [vmem:[%s979_s1 + $0x10] sm:$0xff]  ;;  %v49_v54 = vmul.f32 1.8973666, %v33_v51  ;;  %v793_v59 = vpack.c.bf16 %v232_v50, %v231_v47  ;;  %v183_v2 = vld [vmem:[#allocation2 + $0x200] sm:$0xff] }
  0x2d   :  { %754 = vmatprep.subr.bf16.mxu1 %v753_v21  ;;  %v543_v49 = vadd.f32 -0.9486833, %v50_v41  ;;  %828 = vtanh.f32 %v72_v44  ;;  %v65_v55 = vmul.f32 0.31622776, %v41_v52  ;;  %v184_v3 = vld [vmem:[#allocation2 + $0x208] sm:$0xff]  ;;  %v201_v6 = vld [vmem:[#allocation2 + $0x290] sm:$0xff] }
  0x2e   :  { %724 = vmatpush3.bf16.msra.mxu0 %v723_v32  ;;  %830 = vtanh.f32 %v71_v48  ;;  %v542_v60 = vadd.f32 -0.9486833, %v49_v54  ;;  %v202_v7 = vld [vmem:[#allocation2 + $0x298] sm:$0xff]  ;;  %v763_v11 = vpack.c.bf16 %v184_v3, %v183_v2  ;;  %v215_v12 = vld [vmem:[#allocation2 + $0x300] sm:$0xff]  ;;  %v216_v16 = vld [vmem:[#allocation2 + $0x308] sm:$0xff] }
  0x2f   :  { %726 = vmatprep.subr.bf16.mxu0 %v725_v39  ;;  %v74_v58 = vadd.f32 %v543_v49, %v66_v42  ;;  %v765_v17 = vpack.c.bf16 %v202_v7, %v201_v6  ;;  %v185_v18 = vld [vmem:[#allocation2 + $0x210] sm:$0xff]  ;;  %v186_v19 = vld [vmem:[#allocation2 + $0x218] sm:$0xff]  ;;  %v203_v22 = vld [vmem:[#allocation2 + $0x2a0] sm:$0xff]  ;;  %v795_v36 = vpack.c.bf16 %v216_v16, %v215_v12 }
  0x30   :  { %756 = vmatpush3.bf16.msra.mxu1 %v755_v33  ;;  %v73_v61 = vadd.f32 %v542_v60, %v65_v55  ;;  %v233_v21 = vld [vmem:[#allocation2 + $0x390] sm:$0xff]  ;;  %v204_v23 = vld [vmem:[#allocation2 + $0x2a8] sm:$0xff]  ;;  %v234_v25 = vld [vmem:[#allocation2 + $0x398] sm:$0xff]  ;;  %v767_v29 = vpack.c.bf16 %v186_v19, %v185_v18 }
  0x31   :  { %758 = vmatprep.subr.bf16.mxu1 %v757_v43  ;;  %832 = vtanh.f32 %v74_v58  ;;  %v187_v26 = vld [vmem:[#allocation2 + $0x220] sm:$0xff]  ;;  %v188_v27 = vld [vmem:[#allocation2 + $0x228] sm:$0xff]  ;;  %v217_v30 = vld [vmem:[#allocation2 + $0x310] sm:$0xff]  ;;  %v769_v37 = vpack.c.bf16 %v204_v23, %v203_v22  ;;  %v797_v45 = vpack.c.bf16 %v234_v25, %v233_v21 }
  0x32   :  { %728 = vmatpush3.bf16.msra.mxu0 %v727_v53  ;;  %834 = vtanh.f32 %v73_v61  ;;  %v218_v31 = vld [vmem:[#allocation2 + $0x318] sm:$0xff]  ;;  %v205_v32 = vld [vmem:[#allocation2 + $0x2b0] sm:$0xff]  ;;  %v36_v34 = vld [vmem:[%s978_s0 + $0x28] sm:$0xff]  ;;  %v771_v52 = vpack.c.bf16 %v188_v27, %v187_v26 }
  0x33   :  { %762 = vmatprep.subr.bf16.mxu0 %v761_v57  ;;  %v206_v33 = vld [vmem:[#allocation2 + $0x2b8] sm:$0xff]  ;;  %v44_v35 = vld [vmem:[%s979_s1 + $0x28] sm:$0xff]  ;;  %v235_v38 = vld [vmem:[#allocation2 + $0x3a0] sm:$0xff]  ;;  %v52_v40 = vmul.f32 1.8973666, %v36_v34 }
  0x34   :  { %760 = vmatpush3.bf16.msra.mxu1 %v759_v56  ;;  %v236_v39 = vld [vmem:[#allocation2 + $0x3a8] sm:$0xff]  ;;  %v68_v41 = vmul.f32 0.31622776, %v44_v35  ;;  %v35_v42 = vld [vmem:[%s978_s0 + $0x20] sm:$0xff]  ;;  %v38_v49 = vld [vmem:[%s978_s0 + $0x38] sm:$0xff] }
  0x35   :  { %794 = vmatprep.subr.bf16.mxu1 %v793_v59  ;;  %v43_v43 = vld [vmem:[%s979_s1 + $0x20] sm:$0xff]  ;;  %v51_v46 = vmul.f32 1.8973666, %v35_v42  ;;  %v46_v50 = vld [vmem:[%s979_s1 + $0x38] sm:$0xff]  ;;  %v37_v51 = vld [vmem:[%s978_s0 + $0x30] sm:$0xff]  ;;  %v773_v59 = vpack.c.bf16 %v206_v33, %v205_v32 }
  0x36   :  { %v67_v47 = vmul.f32 0.31622776, %v43_v43  ;;  %v219_v53 = vld [vmem:[#allocation2 + $0x320] sm:$0xff]  ;;  %v220_v54 = vld [vmem:[#allocation2 + $0x328] sm:$0xff]  ;;  %v54_v56 = vmul.f32 1.8973666, %v38_v49 }
  0x37   :  { %v829_v62 = vpop.eup %828  ;;  %v544_v55 = vadd.f32 -0.9486833, %v51_v46  ;;  %v70_v57 = vmul.f32 0.31622776, %v46_v50  ;;  %v189_v60 = vld [vmem:[#allocation2 + $0x230] sm:$0xff]  ;;  %v207_v2 = vld [vmem:[#allocation2 + $0x2c0] sm:$0xff]  ;;  %v803_v12 = vpack.c.bf16 %v220_v54, %v219_v53 }
  0x38   :  { %v831_v63 = vpop.eup %830  ;;  %v88_v0 = vmul.f32 0.31622776, %v829_v62  ;;  %v208_v3 = vld [vmem:[#allocation2 + $0x2c8] sm:$0xff]  ;;  %v237_v7 = vld [vmem:[#allocation2 + $0x3b0] sm:$0xff]  ;;  %v222_v19 = vld [vmem:[#allocation2 + $0x338] sm:$0xff] }
  0x39   :  { %v87_v1 = vmul.f32 0.31622776, %v831_v63  ;;  %v45_v63 = vld [vmem:[%s979_s1 + $0x30] sm:$0xff]  ;;  %v192_v16 = vld [vmem:[#allocation2 + $0x248] sm:$0xff]  ;;  %v210_v21 = vld [vmem:[#allocation2 + $0x2d8] sm:$0xff] }
  0x3a   :  { %v96_v5 = vsub.f32 %v72_v44, %v88_v0  ;;  %v53_v0 = vmul.f32 1.8973666, %v37_v51  ;;  %v69_v6 = vmul.f32 0.31622776, %v45_v63  ;;  %v239_v22 = vld [vmem:[#allocation2 + $0x3c0] sm:$0xff]  ;;  %v240_v23 = vld [vmem:[#allocation2 + $0x3c8] sm:$0xff] }
  0x3b   :  { %v833_v4 = vpop.eup %832  ;;  %v95_v8 = vsub.f32 %v71_v48, %v87_v1  ;;  %v545_v48 = vadd.f32 -0.9486833, %v52_v40  ;;  %v801_v1 = vpack.c.bf16 %v236_v39, %v235_v38  ;;  %v223_v26 = vld [vmem:[#allocation2 + $0x340] sm:$0xff]  ;;  %v212_v33 = vld [vmem:[#allocation2 + $0x2e8] sm:$0xff]  ;;  %v241_v34 = vld [vmem:[#allocation2 + $0x3d0] sm:$0xff] }
  0x3c   :  { %v90_v9 = vmul.f32 0.31622776, %v833_v4  ;;  %v549_v10 = vclamps-f32 %v96_v5, 0.9486833  ;;  %v835_v13 = vpop.eup %834  ;;  %v958_v4 = vadd.f32 %v544_v55, %v67_v47  ;;  %v547_v5 = vadd.f32 -0.9486833, %v54_v56 }
  0x3d   :  { %v548_v14 = vclamps-f32 %v95_v8, 0.9486833  ;;  %v89_v20 = vmul.f32 0.31622776, %v835_v13  ;;  %v953_v62 = vadd.f32 %v545_v48, %v68_v41  ;;  %v238_v8 = vld [vmem:[#allocation2 + $0x3b8] sm:$0xff]  ;;  %v221_v13 = vld [vmem:[#allocation2 + $0x330] sm:$0xff] }
  0x3e   :  { %v98_v15 = vsub.f32 %v74_v58, %v90_v9  ;;  %318 = vmatprep.mubr.f32.mxu0 %v549_v10  ;;  %v799_v58 = vpack.c.bf16 %v218_v31, %v217_v30  ;;  %v546_v9 = vadd.f32 -0.9486833, %v53_v0  ;;  %v805_v18 = vpack.c.bf16 %v238_v8, %v237_v7  ;;  %v224_v31 = vld [vmem:[#allocation2 + $0x348] sm:$0xff]  ;;  %v211_v32 = vld [vmem:[#allocation2 + $0x2e0] sm:$0xff]  ;;  %v242_v35 = vld [vmem:[#allocation2 + $0x3d8] sm:$0xff] }
  0x3f   :  { %319 = vmatmul.mubr.f32.vlgmr.msra.gmra.mrb[0].mxu0 %v548_v14  ;;  %v97_v28 = vsub.f32 %v73_v61, %v89_v20  ;;  %v190_v61 = vld [vmem:[#allocation2 + $0x238] sm:$0xff]  ;;  %836 = vtanh.f32 %v953_v62  ;;  %v777_v14 = vpack.c.bf16 %v208_v3, %v207_v2  ;;  %v209_v20 = vld [vmem:[#allocation2 + $0x2d0] sm:$0xff]  ;;  %v807_v25 = vpack.c.bf16 %v222_v19, %v221_v13  ;;  %v195_v41 = vld [vmem:[#allocation2 + $0x260] sm:$0xff] }
  0x40   :  { %v551_v24 = vclamps-f32 %v98_v15, 0.9486833  ;;  %764 = vmatpush3.bf16.msra.mxu0 %v763_v11  ;;  %v775_v10 = vpack.c.bf16 %v190_v61, %v189_v60  ;;  %838 = vtanh.f32 %v958_v4  ;;  %v962_v11 = vadd.f32 %v547_v5, %v70_v57  ;;  %v191_v15 = vld [vmem:[#allocation2 + $0x240] sm:$0xff]  ;;  %v225_v39 = vld [vmem:[#allocation2 + $0x350] sm:$0xff]  ;;  %v196_v42 = vld [vmem:[#allocation2 + $0x268] sm:$0xff] }
  0x41   :  { %766 = vmatprep.subr.bf16.mxu0 %v765_v17  ;;  %v550_v44 = vclamps-f32 %v97_v28, 0.9486833  ;;  %v964_v17 = vadd.f32 %v546_v9, %v69_v6  ;;  %v781_v27 = vpack.c.bf16 %v210_v21, %v209_v20  ;;  %v193_v28 = vld [vmem:[#allocation2 + $0x250] sm:$0xff]  ;;  %v809_v30 = vpack.c.bf16 %v240_v23, %v239_v22  ;;  %v214_v47 = vld [vmem:[#allocation2 + $0x2f8] sm:$0xff]  ;;  %v243_v49 = vld [vmem:[#allocation2 + $0x3e0] sm:$0xff] }
  0x42   :  { %388 = vmatprep.mubr.f32.mxu1 %v551_v24  ;;  %840 = vtanh.f32 %v962_v11  ;;  %v779_v24 = vpack.c.bf16 %v192_v16, %v191_v15  ;;  %v811_v38 = vpack.c.bf16 %v224_v31, %v223_v26  ;;  %v785_v40 = vpack.c.bf16 %v212_v33, %v211_v32  ;;  %v213_v46 = vld [vmem:[#allocation2 + $0x2f0] sm:$0xff]  ;;  %v244_v50 = vld [vmem:[#allocation2 + $0x3e8] sm:$0xff]  ;;  %v227_v63 = vld [vmem:[#allocation2 + $0x360] sm:$0xff] }
  0x43   :  { %389 = vmatmul.mubr.f32.vlgmr.msra.gmra.mrb[0].mxu1 %v550_v44  ;;  %842 = vtanh.f32 %v964_v17  ;;  %v813_v44 = vpack.c.bf16 %v242_v35, %v241_v34  ;;  %v787_v53 = vpack.c.bf16 %v196_v42, %v195_v41  ;;  %v789_v57 = vpack.c.bf16 %v214_v47, %v213_v46  ;;  %v228_v0 = vld [vmem:[#allocation2 + $0x368] sm:$0xff]  ;;  %v245_v2 = vld [vmem:[#allocation2 + $0x3f0] sm:$0xff]  ;;  %v246_v3 = vld [vmem:[#allocation2 + $0x3f8] sm:$0xff] }
  0x44   :  { %768 = vmatpush3.bf16.msra.mxu0 %v767_v29  ;;  %796 = vmatpush3.bf16.msra.mxu1 %v795_v36  ;;  %v194_v29 = vld [vmem:[#allocation2 + $0x258] sm:$0xff]  ;;  %v817_v61 = vpack.c.bf16 %v244_v50, %v243_v49  ;;  %v819_v8 = vpack.c.bf16 %v228_v0, %v227_v63  ;;  %v556_v19 = vld [vmem:[%s981_s3] ss:$0 sm:$0xff] }
  0x45   :  { %770 = vmatprep.subr.bf16.mxu0 %v769_v37  ;;  %798 = vmatprep.subr.bf16.mxu1 %v797_v45  ;;  %v783_v36 = vpack.c.bf16 %v194_v29, %v193_v28  ;;  %v226_v45 = vld [vmem:[#allocation2 + $0x358] sm:$0xff] }
  0x46   :  { %v815_v56 = vpack.c.bf16 %v226_v45, %v225_v39  ;;  %v230_v13 = vld [vmem:[#allocation2 + $0x378] sm:$0xff] }
  0x48   :  { %772 = vmatpush3.bf16.msra.mxu0 %v771_v52  ;;  %800 = vmatpush3.bf16.msra.mxu1 %v799_v58  ;;  %v197_v58 = vld [vmem:[#allocation2 + $0x270] sm:$0xff] }
  0x49   :  { %774 = vmatprep.subr.bf16.mxu0 %v773_v59  ;;  %802 = vmatprep.subr.bf16.mxu1 %v801_v1  ;;  %v837_v37 = vpop.eup %836  ;;  %v198_v59 = vld [vmem:[#allocation2 + $0x278] sm:$0xff] }
  0x4a   :  { %v839_v43 = vpop.eup %838  ;;  %v92_v48 = vmul.f32 0.31622776, %v837_v37 }
  0x4b   :  { %v91_v51 = vmul.f32 0.31622776, %v839_v43 }
  0x4c   :  { %776 = vmatpush3.bf16.msra.mxu0 %v775_v10  ;;  %804 = vmatpush3.bf16.msra.mxu1 %v803_v12  ;;  %v841_v52 = vpop.eup %840  ;;  %v100_v54 = vsub.f32 %v953_v62, %v92_v48  ;;  %v791_v62 = vpack.c.bf16 %v198_v59, %v197_v58  ;;  %v821_v10 = vpack.c.bf16 %v246_v3, %v245_v2  ;;  %v229_v12 = vld [vmem:[#allocation2 + $0x370] sm:$0xff] }
  0x4d   :  { %778 = vmatprep.subr.bf16.mxu0 %v777_v14  ;;  %806 = vmatprep.subr.bf16.mxu1 %v805_v18  ;;  %v843_v55 = vpop.eup %842  ;;  %v94_v60 = vmul.f32 0.31622776, %v841_v52  ;;  %v99_v5 = vsub.f32 %v958_v4, %v91_v51  ;;  %v823_v4 = vpack.c.bf16 %v230_v13, %v229_v12 }
  0x4e   :  { %v553_v1 = vclamps-f32 %v100_v54, 0.9486833  ;;  %v93_v7 = vmul.f32 0.31622776, %v843_v55 }
  0x4f   :  { %v102_v6 = vsub.f32 %v962_v11, %v94_v60  ;;  %v552_v14 = vclamps-f32 %v99_v5, 0.9486833 }
  0x50   :  { %780 = vmatpush3.bf16.msra.mxu0 %v779_v24  ;;  %808 = vmatpush3.bf16.msra.mxu1 %v807_v25  ;;  %v101_v15 = vsub.f32 %v964_v17, %v93_v7 }
  0x51   :  { %782 = vmatprep.subr.bf16.mxu0 %v781_v27  ;;  %810 = vmatprep.subr.bf16.mxu1 %v809_v30  ;;  %v555_v9 = vclamps-f32 %v102_v6, 0.9486833 }
  0x52   :  { %458 = vmatprep.mubr.f32.mxu0 %v553_v1  ;;  %v554_v11 = vclamps-f32 %v101_v15, 0.9486833 }
  0x53   :  { %528 = vmatprep.mubr.f32.mxu1 %v555_v9 }
  0x54   :  { %784 = vmatpush3.bf16.msra.mxu0 %v783_v36  ;;  %812 = vmatpush3.bf16.msra.mxu1 %v811_v38 }
  0x55   :  { %786 = vmatprep.subr.bf16.mxu0 %v785_v40  ;;  %814 = vmatprep.subr.bf16.mxu1 %v813_v44 }
  0x58   :  { %788 = vmatpush3.bf16.msra.mxu0 %v787_v53  ;;  %816 = vmatpush3.bf16.msra.mxu1 %v815_v56 }
  0x59   :  { %790 = vmatprep.subr.bf16.mxu0 %v789_v57  ;;  %818 = vmatprep.subr.bf16.mxu1 %v817_v61 }
  0x5c   :  { %792 = vmatpush3.bf16.msra.mxu0 %v791_v62  ;;  %820 = vmatpush3.bf16.msra.mxu1 %v819_v8 }
  0x5d   :  { %822 = vmatprep.subr.bf16.mxu1 %v821_v10 }
  0x5f   :  { %459 = vmatmul.mubr.f32.vlgmr.msra.gmra.mrb[2].mxu0 %v552_v14 }
  0x60   :  { %824 = vmatpush3.bf16.msra.mxu1 %v823_v4 }
  0x63   :  { %529 = vmatmul.mubr.f32.vlgmr.msra.gmra.mrb[2].mxu1 %v554_v11 }
 0x112   :  { %v589_v16 = vpop.f32.mrb[0].mxu0 }
 0x113   :  { %v590_v18 = vpop.f32.mrb[1].mxu0 }
 0x114   :  { %v591_v20 = vadd.f32 %v590_v18, %v589_v16 }
 0x116   :  { %v321_v21 = vadd.f32 %v591_v20, %v556_v19  ;;  %v624_v22 = vpop.f32.mrb[0].mxu1 }
 0x117   :  { %v625_v23 = vpop.f32.mrb[1].mxu1 }
 0x118   :  { %v626_v24 = vadd.f32 %v625_v23, %v624_v22 }
 0x11a   :  { %v391_v25 = vadd.f32 %v626_v24, %v321_v21 }
 0x132   :  { %v659_v17 = vpop.f32.mrb[2].mxu0 }
 0x133   :  { %v660_v26 = vpop.f32.mrb[3].mxu0 }
 0x134   :  { %v661_v27 = vadd.f32 %v660_v26, %v659_v17 }
 0x136   :  { %v461_v28 = vadd.f32 %v661_v27, %v391_v25  ;;  %v694_v29 = vpop.f32.mrb[2].mxu1 }
 0x137   :  { %v695_v30 = vpop.f32.mrb[3].mxu1 }
 0x138   :  { %v696_v31 = vadd.f32 %v695_v30, %v694_v29 }
 0x13a   :  { %v531_v32 = vadd.f32 %v696_v31, %v461_v28 }
 0x13c   :  { %534 = vst [vmem:[%s982_s4] sm:$0xff] %v531_v32 }
 0x13d   :  { %539 = vsyncpa [#allocation3], 1 }

</bundles_post_ra>
